<compile_context>
chip_gen: v5e
topology: v5e:2x2
jax: 0.10.0
libtpu: 0.0.40
codegen_flags: <defaults>
</compile_context>

<pallas_src>
import jax
import jax.numpy as jnp
from jax.experimental import pallas as pl
from jax.experimental.pallas import tpu as pltpu


def augru_cell_kernel(x_ref, h_ref, att_ref, wx_ref, wh_ref,
                      b_rz_ref, b_in_ref, b_hn_ref, hy_ref):
    H = h_ref.shape[-1]

    x = x_ref[...]                      # (TB, I)  bf16
    h = h_ref[...]                      # (TB, H)  bf16
    att = att_ref[...]                  # (TB, 1)  f32 (lane-broadcast on VPU)

    # Two MXU matmuls, bf16 operands, f32 accumulation.
    gi = jnp.dot(x, wx_ref[...], preferred_element_type=jnp.float32)  # (TB,3H)
    gh = jnp.dot(h, wh_ref[...], preferred_element_type=jnp.float32)  # (TB,3H)

    # Fused reset/update gates over the first 2H lanes (pre-summed biases).
    rz = jax.nn.sigmoid(gi[:, :2 * H] + gh[:, :2 * H] + b_rz_ref[...])   # EUP
    reset_gate = rz[:, :H]
    update_gate = rz[:, H:]

    # Candidate state: b_hh's n-chunk must stay inside reset * h_n.
    h_n = gh[:, 2 * H:] + b_hn_ref[...]
    new_state = jnp.tanh(gi[:, 2 * H:] + b_in_ref[...] + reset_gate * h_n)  # EUP

    update_gate = att * update_gate                  # attentional update gate
    h_f32 = h.astype(jnp.float32)
    hy_ref[...] = ((1.0 - update_gate) * h_f32
                   + update_gate * new_state).astype(hy_ref.dtype)


def _round_up(x, m):
    return ((x + m - 1) // m) * m


def _resident_spec(shape):
    """Constant-index BlockSpec, single-buffered (fetched once, stays in VMEM)."""
    idx = lambda i: (0,) * len(shape)
    try:
        return pl.BlockSpec(shape, idx, pipeline_mode=pl.Buffered(1))
    except (TypeError, AttributeError):   # older JAX without pipeline_mode
        return pl.BlockSpec(shape, idx)


def _vmem_limit_bytes(tb, I, H):
    bf16, f32 = 2, 4
    weights = (I + H) * 3 * H * bf16                 # resident, single-buffered
    biases = 4 * H * f32
    acts = 2 * (tb * I * bf16 + tb * H * bf16 + tb * f32)   # 2x-buffered inputs
    outs = 2 * tb * H * f32                                  # 2x-buffered output
    temps = 2 * tb * 3 * H * f32                             # gi / gh accumulators
    est = weights + biases + acts + outs + temps
    return int(min(max(2 * est, 32 * 1024 * 1024), 64 * 1024 * 1024))


def augru_cell_forward(inputs, hx, att_score, weight_ih, weight_hh,
                       bias_ih=None, bias_hh=None, *, block_b=512,
                       out_dtype=None):
    """AUGRUCell forward. inputs:(B,I) hx:(B,H) att_score:(B,) or (B,1).

    weight_ih:(3H,I), weight_hh:(3H,H), biases:(3H,) -- PyTorch layout.
    """
    B, I = inputs.shape
    H = hx.shape[-1]
    out_dtype = out_dtype or hx.dtype

    # Lane-dense (K, 3H) weights, bf16 MXU operands (f32 accumulation in-kernel).
    w_x = weight_ih.T.astype(jnp.bfloat16)                       # (I, 3H)
    w_h = weight_hh.T.astype(jnp.bfloat16)                       # (H, 3H)

    b_ih = (jnp.zeros((3 * H,), jnp.float32) if bias_ih is None
            else bias_ih.astype(jnp.float32))
    b_hh = (jnp.zeros((3 * H,), jnp.float32) if bias_hh is None
            else bias_hh.astype(jnp.float32))
    b_rz = (b_ih[:2 * H] + b_hh[:2 * H]).reshape(1, 2 * H)       # pre-summed r/z
    b_in = b_ih[2 * H:].reshape(1, H)
    b_hn = b_hh[2 * H:].reshape(1, H)

    x = inputs.astype(jnp.bfloat16)
    h = hx.astype(jnp.bfloat16)
    att = att_score.reshape(-1, 1).astype(jnp.float32)           # (B, 1)

    # Batch tile: big (>=128 in production) to amortize per-step overhead;
    # shrink so the grid has >=2 steps when B allows (both v7x TCs get work).
    if B <= 8:
        tb = B
    else:
        tb = min(block_b, _round_up(B, 8))
        if pl.cdiv(B, tb) < 2:
            tb = max(8, _round_up(pl.cdiv(B, 2), 8))
    grid = (pl.cdiv(B, tb),)

    hy = pl.pallas_call(
        augru_cell_kernel,
        out_shape=jax.ShapeDtypeStruct((B, H), out_dtype),
        grid=grid,
        in_specs=[
            pl.BlockSpec((tb, I), lambda i: (i, 0)),      # inputs tile (bf16)
            pl.BlockSpec((tb, H), lambda i: (i, 0)),      # hx tile     (bf16)
            pl.BlockSpec((tb, 1), lambda i: (i, 0)),      # att tile    (f32)
            _resident_spec((I, 3 * H)),                   # W_ih^T (resident)
            _resident_spec((H, 3 * H)),                   # W_hh^T (resident)
            _resident_spec((1, 2 * H)),                   # b_ih+b_hh (r,z)
            _resident_spec((1, H)),                       # b_ih (n)
            _resident_spec((1, H)),                       # b_hh (n)
        ],
        out_specs=pl.BlockSpec((tb, H), lambda i: (i, 0)),
        compiler_params=pltpu.CompilerParams(
            dimension_semantics=("parallel",),            # 2 TCs on v7x
            vmem_limit_bytes=_vmem_limit_bytes(tb, I, H)),
    )(x, h, att, w_x, w_h, b_rz, b_in, b_hn)
    return hy


if __name__ == "__main__":
    key = jax.random.PRNGKey(0)
    B, I, H = 8, 16, 32
    ks = jax.random.split(key, 6)

    # Parameters in PyTorch layout (module zero-inits biases; small random
    # biases here to exercise the full bias path of the kernel).
    weight_ih = 0.1 * jax.random.normal(ks[0], (3 * H, I), jnp.float32)
    weight_hh = 0.1 * jax.random.normal(ks[1], (3 * H, H), jnp.float32)
    bias_ih = 0.01 * jax.random.normal(ks[2], (3 * H,), jnp.float32)
    bias_hh = 0.01 * jax.random.normal(ks[3], (3 * H,), jnp.float32)

    inputs = jax.random.normal(ks[4], (B, I), jnp.float32)
    kh, ka = jax.random.split(ks[5])
    hx = jax.random.normal(kh, (B, H), jnp.float32)
    att_score = jax.random.uniform(ka, (B,), jnp.float32)

    hy = augru_cell_forward(inputs, hx, att_score,
                            weight_ih, weight_hh, bias_ih, bias_hh)
    hy = jax.block_until_ready(hy)

    # Pure-JAX f32 reference mirroring the PyTorch forward exactly.
    gi = inputs @ weight_ih.T + bias_ih
    gh = hx @ weight_hh.T + bias_hh
    i_r, i_z, i_n = jnp.split(gi, 3, axis=1)
    h_r, h_z, h_n = jnp.split(gh, 3, axis=1)
    reset_gate = jax.nn.sigmoid(i_r + h_r)
    update_gate = jax.nn.sigmoid(i_z + h_z)
    new_state = jnp.tanh(i_n + reset_gate * h_n)
    update_gate = att_score.reshape(-1, 1) * update_gate
    ref = (1.0 - update_gate) * hx + update_gate * new_state

    assert hy.shape == (B, H)
    # bf16 MXU operands -> looser tolerance than a pure-f32 comparison.
    max_err = float(jnp.max(jnp.abs(hy.astype(jnp.float32) - ref)))
    assert jnp.allclose(hy.astype(jnp.float32), ref, atol=3e-2, rtol=3e-2), max_err
    print("KERNEL_OK")
</pallas_src>

<mosaic_0001>
module attributes {stable_mosaic.version = 11 : i64} {
  func.func @augru_cell_kernel(%arg0: i32, %arg1: memref<8x16xbf16, #tpu.memory_space<vmem>>, %arg2: memref<8x32xbf16, #tpu.memory_space<vmem>>, %arg3: memref<8x1xf32, #tpu.memory_space<vmem>>, %arg4: memref<16x96xbf16, #tpu.memory_space<vmem>>, %arg5: memref<32x96xbf16, #tpu.memory_space<vmem>>, %arg6: memref<1x64xf32, #tpu.memory_space<vmem>>, %arg7: memref<1x32xf32, #tpu.memory_space<vmem>>, %arg8: memref<1x32xf32, #tpu.memory_space<vmem>>, %arg9: memref<8x32xf32, #tpu.memory_space<vmem>>) attributes {dimension_semantics = [#tpu.dimension_semantics<parallel>], iteration_bounds = array<i64: 1>, scalar_prefetch = 0 : i64, scratch_operands = 0 : i64, tpu.core_type = #tpu.core_type<tc>, window_params = [{transform_indices = @transform_0, window_bounds = array<i64: 8, 16>}, {transform_indices = @transform_1, window_bounds = array<i64: 8, 32>}, {transform_indices = @transform_2, window_bounds = array<i64: 8, 1>}, {pipeline_mode = #tpu.pipeline_mode<synchronous>, transform_indices = @transform_3, window_bounds = array<i64: 16, 96>}, {pipeline_mode = #tpu.pipeline_mode<synchronous>, transform_indices = @transform_4, window_bounds = array<i64: 32, 96>}, {pipeline_mode = #tpu.pipeline_mode<synchronous>, transform_indices = @transform_5, window_bounds = array<i64: 1, 64>}, {pipeline_mode = #tpu.pipeline_mode<synchronous>, transform_indices = @transform_6, window_bounds = array<i64: 1, 32>}, {pipeline_mode = #tpu.pipeline_mode<synchronous>, transform_indices = @transform_7, window_bounds = array<i64: 1, 32>}, {transform_indices = @transform_8, window_bounds = array<i64: 8, 32>}]} {
    %c0 = arith.constant 0 : index
    %c0_0 = arith.constant 0 : index
    %0 = vector.load %arg1[%c0, %c0_0] : memref<8x16xbf16, #tpu.memory_space<vmem>>, vector<8x16xbf16>
    %c0_1 = arith.constant 0 : index
    %c0_2 = arith.constant 0 : index
    %1 = vector.load %arg2[%c0_1, %c0_2] : memref<8x32xbf16, #tpu.memory_space<vmem>>, vector<8x32xbf16>
    %c0_3 = arith.constant 0 : index
    %c0_4 = arith.constant 0 : index
    %2 = vector.load %arg3[%c0_3, %c0_4] : memref<8x1xf32, #tpu.memory_space<vmem>>, vector<8x1xf32>
    %c0_5 = arith.constant 0 : index
    %c0_6 = arith.constant 0 : index
    %3 = vector.load %arg4[%c0_5, %c0_6] : memref<16x96xbf16, #tpu.memory_space<vmem>>, vector<16x96xbf16>
    %cst = arith.constant dense<0.000000e+00> : vector<8x96xf32>
    %4 = tpu.matmul %0, %3, %cst {dimension_numbers = #tpu.dot_dimension_numbers<[1], [0], [0], [1], [0, 0, 1, 1], [], []>} : vector<8x16xbf16>, vector<16x96xbf16>, vector<8x96xf32> -> vector<8x96xf32>
    %c0_7 = arith.constant 0 : index
    %c0_8 = arith.constant 0 : index
    %5 = vector.load %arg5[%c0_7, %c0_8] : memref<32x96xbf16, #tpu.memory_space<vmem>>, vector<32x96xbf16>
    %cst_9 = arith.constant dense<0.000000e+00> : vector<8x96xf32>
    %6 = tpu.matmul %1, %5, %cst_9 {dimension_numbers = #tpu.dot_dimension_numbers<[1], [0], [0], [1], [0, 0, 1, 1], [], []>} : vector<8x32xbf16>, vector<32x96xbf16>, vector<8x96xf32> -> vector<8x96xf32>
    %7 = vector.extract_strided_slice %4 {offsets = [0, 0], sizes = [8, 64], strides = [1, 1]} : vector<8x96xf32> to vector<8x64xf32>
    %8 = vector.extract_strided_slice %6 {offsets = [0, 0], sizes = [8, 64], strides = [1, 1]} : vector<8x96xf32> to vector<8x64xf32>
    %9 = arith.addf %7, %8 : vector<8x64xf32>
    %c0_10 = arith.constant 0 : index
    %c0_11 = arith.constant 0 : index
    %10 = vector.load %arg6[%c0_10, %c0_11] : memref<1x64xf32, #tpu.memory_space<vmem>>, vector<1x64xf32>
    %11 = vector.broadcast %10 : vector<1x64xf32> to vector<8x64xf32>
    %12 = arith.addf %9, %11 : vector<8x64xf32>
    %13 = arith.negf %12 : vector<8x64xf32>
    %14 = math.exp %13 : vector<8x64xf32>
    %cst_12 = arith.constant 1.000000e+00 : f32
    %15 = vector.broadcast %cst_12 : f32 to vector<8x64xf32>
    %16 = arith.addf %15, %14 : vector<8x64xf32>
    %17 = arith.divf %15, %16 : vector<8x64xf32>
    %18 = vector.extract_strided_slice %17 {offsets = [0, 0], sizes = [8, 32], strides = [1, 1]} : vector<8x64xf32> to vector<8x32xf32>
    %19 = vector.extract_strided_slice %17 {offsets = [0, 32], sizes = [8, 32], strides = [1, 1]} : vector<8x64xf32> to vector<8x32xf32>
    %20 = vector.extract_strided_slice %6 {offsets = [0, 64], sizes = [8, 32], strides = [1, 1]} : vector<8x96xf32> to vector<8x32xf32>
    %c0_13 = arith.constant 0 : index
    %c0_14 = arith.constant 0 : index
    %21 = vector.load %arg8[%c0_13, %c0_14] : memref<1x32xf32, #tpu.memory_space<vmem>>, vector<1x32xf32>
    %22 = vector.broadcast %21 : vector<1x32xf32> to vector<8x32xf32>
    %23 = arith.addf %20, %22 : vector<8x32xf32>
    %24 = vector.extract_strided_slice %4 {offsets = [0, 64], sizes = [8, 32], strides = [1, 1]} : vector<8x96xf32> to vector<8x32xf32>
    %c0_15 = arith.constant 0 : index
    %c0_16 = arith.constant 0 : index
    %25 = vector.load %arg7[%c0_15, %c0_16] : memref<1x32xf32, #tpu.memory_space<vmem>>, vector<1x32xf32>
    %26 = vector.broadcast %25 : vector<1x32xf32> to vector<8x32xf32>
    %27 = arith.addf %24, %26 : vector<8x32xf32>
    %28 = arith.mulf %18, %23 : vector<8x32xf32>
    %29 = arith.addf %27, %28 : vector<8x32xf32>
    %30 = math.tanh %29 : vector<8x32xf32>
    %31 = vector.broadcast %2 : vector<8x1xf32> to vector<8x32xf32>
    %32 = arith.mulf %31, %19 : vector<8x32xf32>
    %33 = arith.extf %1 : vector<8x32xbf16> to vector<8x32xf32>
    %cst_17 = arith.constant 1.000000e+00 : f32
    %34 = vector.broadcast %cst_17 : f32 to vector<8x32xf32>
    %35 = arith.subf %34, %32 : vector<8x32xf32>
    %36 = arith.mulf %35, %33 : vector<8x32xf32>
    %37 = arith.mulf %32, %30 : vector<8x32xf32>
    %38 = arith.addf %36, %37 : vector<8x32xf32>
    %c0_18 = arith.constant 0 : index
    %c0_19 = arith.constant 0 : index
    %39 = vector.load %arg9[%c0_18, %c0_19] : memref<8x32xf32, #tpu.memory_space<vmem>>, vector<8x32xf32>
    tpu.vector_store %arg9[%c0_18, %c0_19], %38 {strides = array<i32>} : memref<8x32xf32, #tpu.memory_space<vmem>>, vector<8x32xf32>,
    return
  }
  func.func @transform_0(%arg0: i32) -> (i32, i32) {
    %c0_i32 = arith.constant 0 : i32
    %c0_i32_0 = arith.constant 0 : i32
    return %arg0, %c0_i32 : i32, i32
  }
  func.func @transform_1(%arg0: i32) -> (i32, i32) {
    %c0_i32 = arith.constant 0 : i32
    %c0_i32_0 = arith.constant 0 : i32
    return %arg0, %c0_i32 : i32, i32
  }
  func.func @transform_2(%arg0: i32) -> (i32, i32) {
    %c0_i32 = arith.constant 0 : i32
    %c0_i32_0 = arith.constant 0 : i32
    return %arg0, %c0_i32 : i32, i32
  }
  func.func @transform_3(%arg0: i32) -> (i32, i32) {
    %c0_i32 = arith.constant 0 : i32
    %c0_i32_0 = arith.constant 0 : i32
    %c0_i32_1 = arith.constant 0 : i32
    return %c0_i32, %c0_i32_0 : i32, i32
  }
  func.func @transform_4(%arg0: i32) -> (i32, i32) {
    %c0_i32 = arith.constant 0 : i32
    %c0_i32_0 = arith.constant 0 : i32
    %c0_i32_1 = arith.constant 0 : i32
    return %c0_i32, %c0_i32_0 : i32, i32
  }
  func.func @transform_5(%arg0: i32) -> (i32, i32) {
    %c0_i32 = arith.constant 0 : i32
    %c0_i32_0 = arith.constant 0 : i32
    %c0_i32_1 = arith.constant 0 : i32
    return %c0_i32, %c0_i32_0 : i32, i32
  }
  func.func @transform_6(%arg0: i32) -> (i32, i32) {
    %c0_i32 = arith.constant 0 : i32
    %c0_i32_0 = arith.constant 0 : i32
    %c0_i32_1 = arith.constant 0 : i32
    return %c0_i32, %c0_i32_0 : i32, i32
  }
  func.func @transform_7(%arg0: i32) -> (i32, i32) {
    %c0_i32 = arith.constant 0 : i32
    %c0_i32_0 = arith.constant 0 : i32
    %c0_i32_1 = arith.constant 0 : i32
    return %c0_i32, %c0_i32_0 : i32, i32
  }
  func.func @transform_8(%arg0: i32) -> (i32, i32) {
    %c0_i32 = arith.constant 0 : i32
    %c0_i32_0 = arith.constant 0 : i32
    return %arg0, %c0_i32 : i32, i32
  }
}

</mosaic_0001>

<bundles_post_ra>
// kernel: tpu_custom_call.1
= control target key start
LH: loop header
LB: loop body
LE: loop exit
PB: predicated region body
PF: predicated region fallthrough
CT: control target
= control target key end

     0   :  { %13 = vsyncpa [#allocation3], 0  ;;  %s456_s0 = inlined_call_operand.hbm [shape: bf16[8,16], index: 0, kind: input, shape index: {}]   ;;  %s457_s1 = inlined_call_operand.hbm [shape: bf16[8,32], index: 1, kind: input, shape index: {}]   ;;  %s458_s2 = inlined_call_operand.vmem [shape: f32[8,1], index: 2, kind: input, shape index: {}]   ;;  %s459_s3 = inlined_call_operand.vmem [shape: bf16[16,96], index: 3, kind: input, shape index: {}]   ;;  %s460_s4 = inlined_call_operand.hbm [shape: bf16[32,96], index: 4, kind: input, shape index: {}]   ;;  %s461_s5 = inlined_call_operand.vmem [shape: f32[1,64], index: 5, kind: input, shape index: {}]   ;;  %s462_s6 = inlined_call_operand.vmem [shape: f32[1,32], index: 6, kind: input, shape index: {}]   ;;  %s463_s7 = inlined_call_operand.vmem [shape: f32[1,32], index: 7, kind: input, shape index: {}]   ;;  %s464_s8 = inlined_call_operand.hbm [shape: f32[8,32], index: 8, kind: output, shape index: {}]  }
   0x1   :  { %14 = vsyncpa [#allocation6], 0  ;;  %s32_s29 = sshll.u32 %s457_s1, 4  ;;  %s33_s29 = int_to_ptr.hbm [resolvable:$true] %s32_s29 }
   0x2   :  { %15 = vsyncpa [#allocation4], 0  ;;  %s367_s30 = smov [#allocation5]   ;;  %s21_s12 = sshll.u32 %s456_s0, 4  ;;  %s22_s12 = int_to_ptr.hbm [resolvable:$true] %s21_s12 }
   0x3   :  { %s34_s9 = sshll.u32 %s367_s30, 4  ;;  %s368_s13 = smov [#allocation2]   ;;  %s35_s9 = int_to_ptr.vmem [resolvable:$true] %s34_s9 }
   0x4   :  { %37 = dma.hbm_to_vmem [thread:$0]  %s33_s29, 64, %s35_s9, [#allocation6]  }
   0x5   :  { %s23_s14 = sshll.u32 %s368_s13, 4  ;;  %s46_s17 = sshll.u32 %s460_s4, 4  ;;  %s24_s14 = int_to_ptr.vmem [resolvable:$true] %s23_s14  ;;  %s47_s17 = int_to_ptr.hbm [resolvable:$true] %s46_s17 }
   0x6   :  { %26 = dma.hbm_to_vmem [thread:$0]  %s22_s12, 64, %s24_s14, [#allocation3]  }
   0x7   :  { %s369_s1 = smov [#allocation7]   ;;  %s370_s19 = smov 64  }
   0x8   :  { %s48_s18 = sshll.u32 %s369_s1, 4  ;;  %s371_s20 = smov 4   ;;  %s49_s18 = int_to_ptr.vmem [resolvable:$true] %s48_s18 }
   0x9   :  { %54 = dma.hbm_to_vmem [thread:$0]  %s47_s17, 256, %s49_s18, [#allocation6], %s370_s19, %s370_s19, %s371_s20  }
   0xa   :  { %361 = dma.done.wait [#allocation3], 64  }
   0xb   :  { %362 = vsyncadd [#allocation3], 4294967232 }
   0xc   :  { %363 = dma.done.wait [#allocation6], 320  }
   0xd   :  { %364 = vsyncadd [#allocation6], 4294966976  ;;  %v372_v0 = vmov 0   ;;  %v244_v1 = vld [vmem:[#allocation7 + $0x8] sm:$0xff]  ;;  %v242_v2 = vld [vmem:[%s459_s3] sm:$0xff]  ;;  %vm85_vm0 = vcmask 130048  }
   0xe   :  { %254 = vset.pattern.permute.xlu2 %v372_v0  ;;  %255 = vset.pattern.permute.xlu0 %v372_v0  ;;  %v243_v3 = vld [vmem:[#allocation7] sm:$0xff]  ;;  %v74_v4 = vld [vmem:[#allocation2] sm:$0xf]  ;;  %v75_v8 = vld [vmem:[#allocation5] sm:$0xf]  ;;  %vm118_vm1 = vcmask 261120  }
   0xf   :  { %128 = vmatpush.bf16.msra.mxu1 %v244_v1  ;;  %96 = vmatpush.bf16.msra.mxu0 %v242_v2  ;;  %v256_v5 = vld [vmem:[%s463_s7] ss:$0 sm:$0xff]  ;;  %v191_v9 = vunpack.c.l.bf16 %v75_v8  ;;  %s373_s3 = smov 32   ;;  %s375_s7 = smov [#allocation8]  }
  0x10   :  { %v76_v6 = vld [vmem:[%s458_s2] sm:$0xff]  ;;  %163 = vrot.lane.b32.xlu0 %v256_v5, %s370_s19  ;;  %s214_s27 = sshll.u32 %s375_s7, 4  ;;  %s216_s30 = sshll.u32 %s464_s8, 4  ;;  %s215_s27 = int_to_ptr.vmem [resolvable:$true] %s214_s27  ;;  %s217_s30 = int_to_ptr.hbm [resolvable:$true] %s216_s30 }
  0x11   :  { %187 = vperm.xlu2 %254, %v76_v6   ;;  %v257_v7 = vld [vmem:[%s462_s6] ss:$0 sm:$0xff] }
  0x12   :  { %231 = vmatmul.msk.bf16.vlgmr.msra.gmra.mxu0 %vm85_vm0, %v74_v4  ;;  %170 = vrot.lane.b32.xlu1 %v257_v7, %s370_s19  ;;  %v258_v17 = vld [vmem:[%s461_s5] ss:$0 sm:$0xff]  ;;  %s374_s5 = smov 96  }
  0x13   :  { %129 = vmatpush.bf16.msra.mxu1 %v243_v3 }
  0x16   :  { %240 = vmatmul.msk.bf16.vlgmr.msra.gmra.mxu1 %vm118_vm1, %v75_v8 }
  0x19   :  { %194 = vrot.lane.b32.xlu2 %v191_v9, %s373_s3 }
  0x6b   :  { %v188_v39 = vpop.permute.xlu2 %187 }
  0x73   :  { %v195_v42 = vpop.permute.xlu2 %194 }
  0x82   :  { %v164_v11 = vpop.permute.xlu0 %163 }
  0x84   :  { %v171_v34 = vpop.permute.xlu1 %170 }
  0x8f   :  { %v98_v10 = vpop.f32.mrf.mxu0 }
  0x90   :  { %v173_v35 = vadd.f32 %v171_v34, %v98_v10 }
  0x93   :  { %v131_v12 = vpop.f32.mrf.mxu1 }
  0x94   :  { %v135_v13 = vadd.f32 %v131_v12, %v98_v10  ;;  %v166_v14 = vadd.f32 %v164_v11, %v131_v12 }
  0x96   :  { %175 = vrot.lane.b32.xlu0 %v166_v14, %s370_s19  ;;  %v140_v18 = vadd.f32 %v258_v17, %v135_v13 }
  0x97   :  { %v100_v15 = vpop.f32.mrf.mxu0 }
  0x98   :  { %v241_v19 = vmul.f32 -1.442695, %v140_v18 }
  0x9a   :  { %259 = vpow2.f32 %v241_v19 }
  0x9b   :  { %v133_v16 = vpop.f32.mrf.mxu1 }
  0xa0   :  { %v260_v20 = vpop.eup %259 }
  0xa1   :  { %v144_v21 = vadd.f32 1.0, %v260_v20 }
  0xa3   :  { %261 = vrcp.f32 %v144_v21  ;;  %v156_v27 = vand.u32 2147483648, %v144_v21  ;;  %vm150_vm3 = vweird.f32 %v144_v21  ;;  %v154_v28 = vand.u32 2147483647, %v144_v21 }
  0xa5   :  { %v157_v30 = vor.u32 1.1754944e-38, %v156_v27  ;;  %vm155_vm5 = vcmp.eq.f32.partialorder %v154_v28, 8.507059e+37 }
  0xa9   :  { %v262_v22 = vpop.eup %261 }
  0xaa   :  { %v146_v23 = vmul.f32 %v262_v22, %v144_v21  ;;  %vm151_vm2 = vweird.f32 %v262_v22 }
  0xab   :  { %vm152_vm4 = vmor %vm150_vm3, %vm151_vm2 }
  0xac   :  { %v147_v24 = vsub.f32 1.0, %v146_v23 }
  0xae   :  { %v148_v25 = vmul.f32 %v262_v22, %v147_v24 }
  0xb0   :  { %v149_v26 = vadd.f32 %v262_v22, %v148_v25 }
  0xb2   :  { %v153_v29 = vsel %vm152_vm4, %v262_v22, %v149_v26 }
  0xb3   :  { %v158_v31 = vsel %vm155_vm5, %v157_v30, %v153_v29 }
  0xb4   :  { %v190_v40 = vmul.f32 %v188_v39, %v158_v31 }
  0xb6   :  { %v192_v41 = vsub.f32 1.0, %v190_v40 }
  0xb8   :  { %v197_v44 = vmul.f32 %v195_v42, %v192_v41 }
 0x108   :  { %v176_v32 = vpop.permute.xlu0 %175 }
 0x109   :  { %v178_v33 = vmul.f32 %v176_v32, %v158_v31 }
 0x10b   :  { %180 = vrot.lane.b32.xlu1 %v178_v33, %s370_s19 }
 0x17d   :  { %v181_v36 = vpop.permute.xlu1 %180 }
 0x17e   :  { %v183_v37 = vadd.f32 %v181_v36, %v173_v35 }
 0x180   :  { %263 = vtanh.f32 %v183_v37 }
 0x186   :  { %v264_v38 = vpop.eup %263 }
 0x187   :  { %199 = vrot.lane.b32.xlu0 %v264_v38, %s374_s5 }
 0x1f9   :  { %v200_v43 = vpop.permute.xlu0 %199 }
 0x1fa   :  { %v202_v45 = vmul.f32 %v200_v43, %v190_v40 }
 0x1fc   :  { %v203_v46 = vadd.f32 %v202_v45, %v197_v44 }
 0x1fe   :  { %205 = vrot.lane.b32.xlu1 %v203_v46, %s374_s5 }
 0x270   :  { %v206_v47 = vpop.permute.xlu1 %205 }
 0x271   :  { %208 = vst.msk [vmem:[#allocation8] sm:$0xff] %vm118_vm1, %v206_v47 }
 0x272   :  { %219 = dma.vmem_to_hbm [thread:$0]  %s215_s27, 128, %s217_s30, [#allocation4]  }
 0x273   :  { %365 = dma.done.wait [#allocation4], 128  }
 0x274   :  { %366 = vsyncadd [#allocation4], 4294967168 }
 0x275   :  { %224 = vsyncpa [#allocation3], 1 }
 0x276   :  { %225 = vsyncpa [#allocation6], 1 }
 0x277   :  { %226 = vsyncpa [#allocation4], 1 }

</bundles_post_ra>
